<compile_context>
chip_gen: v6e
topology: v6e:2x2x1
jax: 0.10.0
libtpu: 0.0.40
codegen_flags: <defaults>
</compile_context>

<pallas_src>
import functools
import math

import jax
import jax.numpy as jnp
from jax.experimental import pallas as pl
from jax.experimental.pallas import tpu as pltpu


def _transformer_block_kernel(
    x_ref,      # (Bt, S, D)   f32   residual-stream input block
    w1_ref,     # (D, 8D)      bf16  [ Wqkv' (3D) | Wout^T (D) | Wup (4D) ]
    wdown_ref,  # (4D, D)      bf16
    b_ref,      # (1, 4D)      f32   [ bqkv' (3D) | bout (D) ]
    o_ref,      # (Bt, S, D)   f32
    *,
    num_heads: int,
    d_head: int,
):
    Bt, S, D = x_ref.shape
    N = Bt * S
    H, dh = num_heads, d_head
    D3 = 3 * D
    bf16 = jnp.bfloat16

    # Merge (batch, seq) rows; minor (lane) dim untouched -> layout-trivial.
    x = x_ref[...].reshape(N, D)

    # ---- LayerNorm 1 statistics (eps = 1e-5). gamma/beta folded into Wqkv'. ----
    mu = jnp.mean(x, axis=-1, keepdims=True)
    var = jnp.mean((x - mu) ** 2, axis=-1, keepdims=True)
    xn = ((x - mu) * jax.lax.rsqrt(var + 1e-5)).astype(bf16)

    # ---- Fused QKV projection: one MXU push for all heads. -------------------
    # 1/sqrt(dh) already folded into the Q columns/bias on the host.
    qkv = (jnp.dot(xn, w1_ref[:, :D3], preferred_element_type=jnp.float32)
           + b_ref[:, :D3])                                   # (N, 3D) f32

    # ---- Per-head attention (static loop, H small; dh-lane static slices). ----
    heads = []
    for h in range(H):
        lo = h * dh
        q = qkv[:, lo:lo + dh].reshape(Bt, S, dh).astype(bf16)
        k = qkv[:, D + lo:D + lo + dh].reshape(Bt, S, dh).astype(bf16)
        v = qkv[:, 2 * D + lo:2 * D + lo + dh].reshape(Bt, S, dh).astype(bf16)

        s = jnp.einsum("bqd,bkd->bqk", q, k,
                       preferred_element_type=jnp.float32)    # (Bt, S, S)
        s = s - jnp.max(s, axis=-1, keepdims=True)
        p = jnp.exp(s)
        p = p * pl.reciprocal(jnp.sum(p, axis=-1, keepdims=True), approx=True)

        heads.append(jnp.einsum("bqk,bkd->bqd", p.astype(bf16), v,
                                preferred_element_type=jnp.float32))

    # Assemble all heads into one (N, D) tile -> single output-projection push.
    attn = jnp.concatenate(heads, axis=-1).reshape(N, D).astype(bf16)
    h1 = x + jnp.dot(attn, w1_ref[:, D3:D3 + D],
                     preferred_element_type=jnp.float32) + b_ref[:, D3:]

    # ---- MLP (up -> exact erf-GELU -> down) + residual 2 (ln2 unused, as in torch).
    up = jnp.dot(h1.astype(bf16), w1_ref[:, D3 + D:],
                 preferred_element_type=jnp.float32)           # (N, 4D) f32
    act = 0.5 * up * (1.0 + jax.lax.erf(up * (1.0 / math.sqrt(2.0))))
    down = jnp.dot(act.astype(bf16), wdown_ref[...],
                   preferred_element_type=jnp.float32)

    o_ref[...] = (h1 + down).reshape(Bt, S, D)


def prepare_params(params, *, num_heads, d_head):
    """Host-side one-time prep: fold ln1 affine and 1/sqrt(d_head) into the
    fused QKV weights/bias, concatenate weights/biases into few DMA slabs,
    cast MXU operands to bf16."""
    D = params["wqkv_t"].shape[0]
    g = params["ln1_g"].reshape(D)
    b = params["ln1_b"].reshape(D)

    # (xn*g + b) @ Wqkv^T + bqkv  ==  xn @ (g[:,None]*Wqkv^T) + (b @ Wqkv^T + bqkv)
    wqkv = g[:, None] * params["wqkv_t"]                       # (D, 3D) f32
    bqkv = params["bqkv"].reshape(3 * D) + b @ params["wqkv_t"]

    inv_sqrt_dh = 1.0 / math.sqrt(d_head)
    wqkv = wqkv.at[:, :D].multiply(inv_sqrt_dh)                # fold score scale into Q
    bqkv = bqkv.at[:D].multiply(inv_sqrt_dh)

    w1 = jnp.concatenate(
        [wqkv, params["wout_t"], params["wup_t"]], axis=1
    ).astype(jnp.bfloat16)                                     # (D, 8D)
    bias = jnp.concatenate(
        [bqkv, params["bout"].reshape(D)]
    ).reshape(1, 4 * D).astype(jnp.float32)                    # (1, 4D)

    return dict(
        w1=w1,
        wdown=params["wdown_t"].astype(jnp.bfloat16),          # (4D, D)
        bias=bias,
    )


def _default_block_b(B):
    """grid=(1,) on single-TC chips (v5e/v6e); split the batch across the two
    TensorCores on v7x when possible."""
    try:
        kind = jax.devices()[0].device_kind.lower()
    except Exception:
        kind = ""
    if "v7" in kind and B >= 2 and B % 2 == 0:
        return B // 2
    return B


def transformer_block(x, prep, *, num_heads, d_head, block_b=None):
    """x: (B, S, D) f32.  prep: output of prepare_params (bf16 weight slabs)."""
    B, S, D = x.shape
    if block_b is None:
        block_b = _default_block_b(B)
    assert B % block_b == 0
    grid = (B // block_b,)

    kernel = functools.partial(_transformer_block_kernel,
                               num_heads=num_heads, d_head=d_head)

    def full(a):
        # Grid-invariant (resident) weight slab: same block every step.
        return pl.BlockSpec(a.shape, lambda i, _nd=a.ndim: (0,) * _nd)

    return pl.pallas_call(
        kernel,
        out_shape=jax.ShapeDtypeStruct((B, S, D), jnp.float32),
        grid_spec=pltpu.PrefetchScalarGridSpec(
            num_scalar_prefetch=0,
            grid=grid,
            in_specs=[
                pl.BlockSpec((block_b, S, D), lambda i: (i, 0, 0)),   # x
                full(prep["w1"]),
                full(prep["wdown"]),
                full(prep["bias"]),
            ],
            out_specs=pl.BlockSpec((block_b, S, D), lambda i: (i, 0, 0)),
        ),
        compiler_params=pltpu.CompilerParams(
            dimension_semantics=("parallel",),
            vmem_limit_bytes=32 * 1024 * 1024,
        ),
    )(x, prep["w1"], prep["wdown"], prep["bias"])


def _reference(x, params, *, num_heads, d_head):
    """Pure-JAX f32 reference of the same forward pass (uses the raw params)."""
    B, S, D = x.shape
    mu = jnp.mean(x, axis=-1, keepdims=True)
    var = jnp.mean((x - mu) ** 2, axis=-1, keepdims=True)
    xn = (x - mu) / jnp.sqrt(var + 1e-5) * params["ln1_g"] + params["ln1_b"]
    qkv = xn @ params["wqkv_t"] + params["bqkv"]
    q, k, v = jnp.split(qkv, 3, axis=-1)
    rs = lambda t: t.reshape(B, S, num_heads, d_head).transpose(0, 2, 1, 3)
    q, k, v = rs(q), rs(k), rs(v)
    s = jnp.einsum("bhqd,bhkd->bhqk", q, k) / math.sqrt(d_head)
    p = jax.nn.softmax(s, axis=-1)
    o = jnp.einsum("bhqk,bhkd->bhqd", p, v).transpose(0, 2, 1, 3).reshape(B, S, D)
    h1 = x + (o @ params["wout_t"] + params["bout"])
    up = h1 @ params["wup_t"]
    act = 0.5 * up * (1.0 + jax.lax.erf(up / math.sqrt(2.0)))
    return h1 + act @ params["wdown_t"]


if __name__ == "__main__":
    # Small shapes consistent with the module: d_model=32, d_head=8 -> 4 heads,
    # d_ff=4 -> hidden 128; batch=2, seq=8.
    B, S, D, d_head = 2, 8, 32, 8
    num_heads = D // d_head
    H_ff = 4 * D

    key = jax.random.PRNGKey(0)
    ks = jax.random.split(key, 9)
    scale = 0.05
    params = {
        "wqkv_t":  (scale * jax.random.normal(ks[0], (D, 3 * D))).astype(jnp.float32),
        "bqkv":    (scale * jax.random.normal(ks[1], (3 * D,))).astype(jnp.float32),
        "wout_t":  (scale * jax.random.normal(ks[2], (D, D))).astype(jnp.float32),
        "bout":    (scale * jax.random.normal(ks[3], (D,))).astype(jnp.float32),
        "ln1_g":   (1.0 + scale * jax.random.normal(ks[4], (D,))).astype(jnp.float32),
        "ln1_b":   (scale * jax.random.normal(ks[5], (D,))).astype(jnp.float32),
        "wup_t":   (scale * jax.random.normal(ks[6], (D, H_ff))).astype(jnp.float32),
        "wdown_t": (scale * jax.random.normal(ks[7], (H_ff, D))).astype(jnp.float32),
    }
    x = jax.random.normal(ks[8], (B, S, D), dtype=jnp.float32)

    prep = prepare_params(params, num_heads=num_heads, d_head=d_head)
    out = transformer_block(x, prep, num_heads=num_heads, d_head=d_head)
    out = jax.block_until_ready(out)

    ref = _reference(x, params, num_heads=num_heads, d_head=d_head)
    assert out.shape == (B, S, D)
    max_err = float(jnp.max(jnp.abs(out - ref)))
    # bf16 MXU operands + approx reciprocal: fp16-parity with the torch module,
    # not bit-exact f32, hence the relaxed tolerance.
    assert jnp.allclose(out, ref, rtol=2e-2, atol=2e-2), \
        f"mismatch vs reference (max err {max_err})"

    print("KERNEL_OK")
</pallas_src>

<mosaic_0001>
module attributes {stable_mosaic.version = 11 : i64} {
  func.func @_transformer_block_kernel(%arg0: i32, %arg1: memref<2x8x32xf32, #tpu.memory_space<vmem>>, %arg2: memref<32x256xbf16, #tpu.memory_space<vmem>>, %arg3: memref<128x32xbf16, #tpu.memory_space<vmem>>, %arg4: memref<1x128xf32, #tpu.memory_space<vmem>>, %arg5: memref<2x8x32xf32, #tpu.memory_space<vmem>>) attributes {dimension_semantics = [#tpu.dimension_semantics<parallel>], iteration_bounds = array<i64: 1>, scalar_prefetch = 0 : i64, scratch_operands = 0 : i64, tpu.core_type = #tpu.core_type<tc>, window_params = [{transform_indices = @transform_0, window_bounds = array<i64: 2, 8, 32>}, {pipeline_mode = #tpu.pipeline_mode<synchronous>, transform_indices = @transform_1, window_bounds = array<i64: 32, 256>}, {pipeline_mode = #tpu.pipeline_mode<synchronous>, transform_indices = @transform_2, window_bounds = array<i64: 128, 32>}, {pipeline_mode = #tpu.pipeline_mode<synchronous>, transform_indices = @transform_3, window_bounds = array<i64: 1, 128>}, {transform_indices = @transform_4, window_bounds = array<i64: 2, 8, 32>}]} {
    %c0 = arith.constant 0 : index
    %c0_0 = arith.constant 0 : index
    %c0_1 = arith.constant 0 : index
    %0 = vector.load %arg1[%c0, %c0_0, %c0_1] : memref<2x8x32xf32, #tpu.memory_space<vmem>>, vector<2x8x32xf32>
    %1 = vector.shape_cast %0 : vector<2x8x32xf32> to vector<16x32xf32>
    %cst = arith.constant dense<0.000000e+00> : vector<16xf32>
    %2 = vector.multi_reduction <add>, %1, %cst [1] : vector<16x32xf32> to vector<16xf32>
    %3 = vector.shape_cast %2 : vector<16xf32> to vector<16x1xf32>
    %cst_2 = arith.constant 3.200000e+01 : f32
    %4 = vector.broadcast %cst_2 : f32 to vector<16x1xf32>
    %5 = arith.divf %3, %4 : vector<16x1xf32>
    %6 = vector.broadcast %5 : vector<16x1xf32> to vector<16x32xf32>
    %7 = arith.subf %1, %6 : vector<16x32xf32>
    %8 = arith.mulf %7, %7 : vector<16x32xf32>
    %cst_3 = arith.constant dense<0.000000e+00> : vector<16xf32>
    %9 = vector.multi_reduction <add>, %8, %cst_3 [1] : vector<16x32xf32> to vector<16xf32>
    %10 = vector.shape_cast %9 : vector<16xf32> to vector<16x1xf32>
    %cst_4 = arith.constant 3.200000e+01 : f32
    %11 = vector.broadcast %cst_4 : f32 to vector<16x1xf32>
    %12 = arith.divf %10, %11 : vector<16x1xf32>
    %13 = vector.broadcast %5 : vector<16x1xf32> to vector<16x32xf32>
    %14 = arith.subf %1, %13 : vector<16x32xf32>
    %cst_5 = arith.constant 9.99999974E-6 : f32
    %15 = vector.broadcast %cst_5 : f32 to vector<16x1xf32>
    %16 = arith.addf %12, %15 : vector<16x1xf32>
    %17 = math.rsqrt %16 : vector<16x1xf32>
    %18 = vector.broadcast %17 : vector<16x1xf32> to vector<16x32xf32>
    %19 = arith.mulf %14, %18 : vector<16x32xf32>
    %20 = arith.truncf %19 : vector<16x32xf32> to vector<16x32xbf16>
    %c0_6 = arith.constant 0 : index
    %c0_7 = arith.constant 0 : index
    %21 = vector.load %arg2[%c0_6, %c0_7] : memref<32x256xbf16, #tpu.memory_space<vmem>>, vector<32x96xbf16>
    %cst_8 = arith.constant dense<0.000000e+00> : vector<16x96xf32>
    %22 = tpu.matmul %20, %21, %cst_8 {dimension_numbers = #tpu.dot_dimension_numbers<[1], [0], [0], [1], [0, 0, 1, 1], [], []>} : vector<16x32xbf16>, vector<32x96xbf16>, vector<16x96xf32> -> vector<16x96xf32>
    %c0_9 = arith.constant 0 : index
    %c0_10 = arith.constant 0 : index
    %23 = vector.load %arg4[%c0_9, %c0_10] : memref<1x128xf32, #tpu.memory_space<vmem>>, vector<1x96xf32>
    %24 = vector.broadcast %23 : vector<1x96xf32> to vector<16x96xf32>
    %25 = arith.addf %22, %24 : vector<16x96xf32>
    %26 = vector.extract_strided_slice %25 {offsets = [0, 0], sizes = [16, 8], strides = [1, 1]} : vector<16x96xf32> to vector<16x8xf32>
    %27 = vector.shape_cast %26 : vector<16x8xf32> to vector<2x8x8xf32>
    %28 = arith.truncf %27 : vector<2x8x8xf32> to vector<2x8x8xbf16>
    %29 = vector.extract_strided_slice %25 {offsets = [0, 32], sizes = [16, 8], strides = [1, 1]} : vector<16x96xf32> to vector<16x8xf32>
    %30 = vector.shape_cast %29 : vector<16x8xf32> to vector<2x8x8xf32>
    %31 = arith.truncf %30 : vector<2x8x8xf32> to vector<2x8x8xbf16>
    %32 = vector.extract_strided_slice %25 {offsets = [0, 64], sizes = [16, 8], strides = [1, 1]} : vector<16x96xf32> to vector<16x8xf32>
    %33 = vector.shape_cast %32 : vector<16x8xf32> to vector<2x8x8xf32>
    %34 = arith.truncf %33 : vector<2x8x8xf32> to vector<2x8x8xbf16>
    "tpu.trace_start"() <{level = 10 : i32, message = "bqd,bkd->bqk"}> : () -> ()
    %cst_11 = arith.constant dense<0.000000e+00> : vector<2x8x8xf32>
    %35 = tpu.matmul %28, %31, %cst_11 {dimension_numbers = #tpu.dot_dimension_numbers<[2], [2], [1], [1], [0, 0, 0, 1, 1, 1], [0], [0]>} : vector<2x8x8xbf16>, vector<2x8x8xbf16>, vector<2x8x8xf32> -> vector<2x8x8xf32>
    "tpu.trace_stop"() : () -> ()
    %cst_12 = arith.constant dense<0xFF800000> : vector<2x8xf32>
    %36 = vector.multi_reduction <maximumf>, %35, %cst_12 [2] : vector<2x8x8xf32> to vector<2x8xf32>
    %37 = vector.shape_cast %36 : vector<2x8xf32> to vector<2x8x1xf32>
    %38 = vector.broadcast %37 : vector<2x8x1xf32> to vector<2x8x8xf32>
    %39 = arith.subf %35, %38 : vector<2x8x8xf32>
    %40 = math.exp %39 : vector<2x8x8xf32>
    %cst_13 = arith.constant dense<0.000000e+00> : vector<2x8xf32>
    %41 = vector.multi_reduction <add>, %40, %cst_13 [2] : vector<2x8x8xf32> to vector<2x8xf32>
    %42 = vector.shape_cast %41 : vector<2x8xf32> to vector<2x8x1xf32>
    %43 = tpu.reciprocal %42 {approx = true} : vector<2x8x1xf32> -> vector<2x8x1xf32>
    %44 = vector.broadcast %43 : vector<2x8x1xf32> to vector<2x8x8xf32>
    %45 = arith.mulf %40, %44 : vector<2x8x8xf32>
    %46 = arith.truncf %45 : vector<2x8x8xf32> to vector<2x8x8xbf16>
    "tpu.trace_start"() <{level = 10 : i32, message = "bqk,bkd->bqd"}> : () -> ()
    %cst_14 = arith.constant dense<0.000000e+00> : vector<2x8x8xf32>
    %47 = tpu.matmul %46, %34, %cst_14 {dimension_numbers = #tpu.dot_dimension_numbers<[2], [1], [1], [2], [0, 0, 0, 1, 1, 2], [0], [0]>} : vector<2x8x8xbf16>, vector<2x8x8xbf16>, vector<2x8x8xf32> -> vector<2x8x8xf32>
    "tpu.trace_stop"() : () -> ()
    %48 = vector.extract_strided_slice %25 {offsets = [0, 8], sizes = [16, 8], strides = [1, 1]} : vector<16x96xf32> to vector<16x8xf32>
    %49 = vector.shape_cast %48 : vector<16x8xf32> to vector<2x8x8xf32>
    %50 = arith.truncf %49 : vector<2x8x8xf32> to vector<2x8x8xbf16>
    %51 = vector.extract_strided_slice %25 {offsets = [0, 40], sizes = [16, 8], strides = [1, 1]} : vector<16x96xf32> to vector<16x8xf32>
    %52 = vector.shape_cast %51 : vector<16x8xf32> to vector<2x8x8xf32>
    %53 = arith.truncf %52 : vector<2x8x8xf32> to vector<2x8x8xbf16>
    %54 = vector.extract_strided_slice %25 {offsets = [0, 72], sizes = [16, 8], strides = [1, 1]} : vector<16x96xf32> to vector<16x8xf32>
    %55 = vector.shape_cast %54 : vector<16x8xf32> to vector<2x8x8xf32>
    %56 = arith.truncf %55 : vector<2x8x8xf32> to vector<2x8x8xbf16>
    "tpu.trace_start"() <{level = 10 : i32, message = "bqd,bkd->bqk"}> : () -> ()
    %cst_15 = arith.constant dense<0.000000e+00> : vector<2x8x8xf32>
    %57 = tpu.matmul %50, %53, %cst_15 {dimension_numbers = #tpu.dot_dimension_numbers<[2], [2], [1], [1], [0, 0, 0, 1, 1, 1], [0], [0]>} : vector<2x8x8xbf16>, vector<2x8x8xbf16>, vector<2x8x8xf32> -> vector<2x8x8xf32>
    "tpu.trace_stop"() : () -> ()
    %cst_16 = arith.constant dense<0xFF800000> : vector<2x8xf32>
    %58 = vector.multi_reduction <maximumf>, %57, %cst_16 [2] : vector<2x8x8xf32> to vector<2x8xf32>
    %59 = vector.shape_cast %58 : vector<2x8xf32> to vector<2x8x1xf32>
    %60 = vector.broadcast %59 : vector<2x8x1xf32> to vector<2x8x8xf32>
    %61 = arith.subf %57, %60 : vector<2x8x8xf32>
    %62 = math.exp %61 : vector<2x8x8xf32>
    %cst_17 = arith.constant dense<0.000000e+00> : vector<2x8xf32>
    %63 = vector.multi_reduction <add>, %62, %cst_17 [2] : vector<2x8x8xf32> to vector<2x8xf32>
    %64 = vector.shape_cast %63 : vector<2x8xf32> to vector<2x8x1xf32>
    %65 = tpu.reciprocal %64 {approx = true} : vector<2x8x1xf32> -> vector<2x8x1xf32>
    %66 = vector.broadcast %65 : vector<2x8x1xf32> to vector<2x8x8xf32>
    %67 = arith.mulf %62, %66 : vector<2x8x8xf32>
    %68 = arith.truncf %67 : vector<2x8x8xf32> to vector<2x8x8xbf16>
    "tpu.trace_start"() <{level = 10 : i32, message = "bqk,bkd->bqd"}> : () -> ()
    %cst_18 = arith.constant dense<0.000000e+00> : vector<2x8x8xf32>
    %69 = tpu.matmul %68, %56, %cst_18 {dimension_numbers = #tpu.dot_dimension_numbers<[2], [1], [1], [2], [0, 0, 0, 1, 1, 2], [0], [0]>} : vector<2x8x8xbf16>, vector<2x8x8xbf16>, vector<2x8x8xf32> -> vector<2x8x8xf32>
    "tpu.trace_stop"() : () -> ()
    %70 = vector.extract_strided_slice %25 {offsets = [0, 16], sizes = [16, 8], strides = [1, 1]} : vector<16x96xf32> to vector<16x8xf32>
    %71 = vector.shape_cast %70 : vector<16x8xf32> to vector<2x8x8xf32>
    %72 = arith.truncf %71 : vector<2x8x8xf32> to vector<2x8x8xbf16>
    %73 = vector.extract_strided_slice %25 {offsets = [0, 48], sizes = [16, 8], strides = [1, 1]} : vector<16x96xf32> to vector<16x8xf32>
    %74 = vector.shape_cast %73 : vector<16x8xf32> to vector<2x8x8xf32>
    %75 = arith.truncf %74 : vector<2x8x8xf32> to vector<2x8x8xbf16>
    %76 = vector.extract_strided_slice %25 {offsets = [0, 80], sizes = [16, 8], strides = [1, 1]} : vector<16x96xf32> to vector<16x8xf32>
    %77 = vector.shape_cast %76 : vector<16x8xf32> to vector<2x8x8xf32>
    %78 = arith.truncf %77 : vector<2x8x8xf32> to vector<2x8x8xbf16>
    "tpu.trace_start"() <{level = 10 : i32, message = "bqd,bkd->bqk"}> : () -> ()
    %cst_19 = arith.constant dense<0.000000e+00> : vector<2x8x8xf32>
    %79 = tpu.matmul %72, %75, %cst_19 {dimension_numbers = #tpu.dot_dimension_numbers<[2], [2], [1], [1], [0, 0, 0, 1, 1, 1], [0], [0]>} : vector<2x8x8xbf16>, vector<2x8x8xbf16>, vector<2x8x8xf32> -> vector<2x8x8xf32>
    "tpu.trace_stop"() : () -> ()
    %cst_20 = arith.constant dense<0xFF800000> : vector<2x8xf32>
    %80 = vector.multi_reduction <maximumf>, %79, %cst_20 [2] : vector<2x8x8xf32> to vector<2x8xf32>
    %81 = vector.shape_cast %80 : vector<2x8xf32> to vector<2x8x1xf32>
    %82 = vector.broadcast %81 : vector<2x8x1xf32> to vector<2x8x8xf32>
    %83 = arith.subf %79, %82 : vector<2x8x8xf32>
    %84 = math.exp %83 : vector<2x8x8xf32>
    %cst_21 = arith.constant dense<0.000000e+00> : vector<2x8xf32>
    %85 = vector.multi_reduction <add>, %84, %cst_21 [2] : vector<2x8x8xf32> to vector<2x8xf32>
    %86 = vector.shape_cast %85 : vector<2x8xf32> to vector<2x8x1xf32>
    %87 = tpu.reciprocal %86 {approx = true} : vector<2x8x1xf32> -> vector<2x8x1xf32>
    %88 = vector.broadcast %87 : vector<2x8x1xf32> to vector<2x8x8xf32>
    %89 = arith.mulf %84, %88 : vector<2x8x8xf32>
    %90 = arith.truncf %89 : vector<2x8x8xf32> to vector<2x8x8xbf16>
    "tpu.trace_start"() <{level = 10 : i32, message = "bqk,bkd->bqd"}> : () -> ()
    %cst_22 = arith.constant dense<0.000000e+00> : vector<2x8x8xf32>
    %91 = tpu.matmul %90, %78, %cst_22 {dimension_numbers = #tpu.dot_dimension_numbers<[2], [1], [1], [2], [0, 0, 0, 1, 1, 2], [0], [0]>} : vector<2x8x8xbf16>, vector<2x8x8xbf16>, vector<2x8x8xf32> -> vector<2x8x8xf32>
    "tpu.trace_stop"() : () -> ()
    %92 = vector.extract_strided_slice %25 {offsets = [0, 24], sizes = [16, 8], strides = [1, 1]} : vector<16x96xf32> to vector<16x8xf32>
    %93 = vector.shape_cast %92 : vector<16x8xf32> to vector<2x8x8xf32>
    %94 = arith.truncf %93 : vector<2x8x8xf32> to vector<2x8x8xbf16>
    %95 = vector.extract_strided_slice %25 {offsets = [0, 56], sizes = [16, 8], strides = [1, 1]} : vector<16x96xf32> to vector<16x8xf32>
    %96 = vector.shape_cast %95 : vector<16x8xf32> to vector<2x8x8xf32>
    %97 = arith.truncf %96 : vector<2x8x8xf32> to vector<2x8x8xbf16>
    %98 = vector.extract_strided_slice %25 {offsets = [0, 88], sizes = [16, 8], strides = [1, 1]} : vector<16x96xf32> to vector<16x8xf32>
    %99 = vector.shape_cast %98 : vector<16x8xf32> to vector<2x8x8xf32>
    %100 = arith.truncf %99 : vector<2x8x8xf32> to vector<2x8x8xbf16>
    "tpu.trace_start"() <{level = 10 : i32, message = "bqd,bkd->bqk"}> : () -> ()
    %cst_23 = arith.constant dense<0.000000e+00> : vector<2x8x8xf32>
    %101 = tpu.matmul %94, %97, %cst_23 {dimension_numbers = #tpu.dot_dimension_numbers<[2], [2], [1], [1], [0, 0, 0, 1, 1, 1], [0], [0]>} : vector<2x8x8xbf16>, vector<2x8x8xbf16>, vector<2x8x8xf32> -> vector<2x8x8xf32>
    "tpu.trace_stop"() : () -> ()
    %cst_24 = arith.constant dense<0xFF800000> : vector<2x8xf32>
    %102 = vector.multi_reduction <maximumf>, %101, %cst_24 [2] : vector<2x8x8xf32> to vector<2x8xf32>
    %103 = vector.shape_cast %102 : vector<2x8xf32> to vector<2x8x1xf32>
    %104 = vector.broadcast %103 : vector<2x8x1xf32> to vector<2x8x8xf32>
    %105 = arith.subf %101, %104 : vector<2x8x8xf32>
    %106 = math.exp %105 : vector<2x8x8xf32>
    %cst_25 = arith.constant dense<0.000000e+00> : vector<2x8xf32>
    %107 = vector.multi_reduction <add>, %106, %cst_25 [2] : vector<2x8x8xf32> to vector<2x8xf32>
    %108 = vector.shape_cast %107 : vector<2x8xf32> to vector<2x8x1xf32>
    %109 = tpu.reciprocal %108 {approx = true} : vector<2x8x1xf32> -> vector<2x8x1xf32>
    %110 = vector.broadcast %109 : vector<2x8x1xf32> to vector<2x8x8xf32>
    %111 = arith.mulf %106, %110 : vector<2x8x8xf32>
    %112 = arith.truncf %111 : vector<2x8x8xf32> to vector<2x8x8xbf16>
    "tpu.trace_start"() <{level = 10 : i32, message = "bqk,bkd->bqd"}> : () -> ()
    %cst_26 = arith.constant dense<0.000000e+00> : vector<2x8x8xf32>
    %113 = tpu.matmul %112, %100, %cst_26 {dimension_numbers = #tpu.dot_dimension_numbers<[2], [1], [1], [2], [0, 0, 0, 1, 1, 2], [0], [0]>} : vector<2x8x8xbf16>, vector<2x8x8xbf16>, vector<2x8x8xf32> -> vector<2x8x8xf32>
    "tpu.trace_stop"() : () -> ()
    %114 = tpu.concatenate %47, %69, %91, %113 in 2 : vector<2x8x8xf32>, vector<2x8x8xf32>, vector<2x8x8xf32>, vector<2x8x8xf32> -> vector<2x8x32xf32>
    %115 = vector.shape_cast %114 : vector<2x8x32xf32> to vector<16x32xf32>
    %116 = arith.truncf %115 : vector<16x32xf32> to vector<16x32xbf16>
    %c0_27 = arith.constant 0 : index
    %c96 = arith.constant 96 : index
    %117 = vector.load %arg2[%c0_27, %c96] : memref<32x256xbf16, #tpu.memory_space<vmem>>, vector<32x32xbf16>
    %cst_28 = arith.constant dense<0.000000e+00> : vector<16x32xf32>
    %118 = tpu.matmul %116, %117, %cst_28 {dimension_numbers = #tpu.dot_dimension_numbers<[1], [0], [0], [1], [0, 0, 1, 1], [], []>} : vector<16x32xbf16>, vector<32x32xbf16>, vector<16x32xf32> -> vector<16x32xf32>
    %119 = arith.addf %1, %118 : vector<16x32xf32>
    %c0_29 = arith.constant 0 : index
    %c96_30 = arith.constant 96 : index
    %120 = vector.load %arg4[%c0_29, %c96_30] : memref<1x128xf32, #tpu.memory_space<vmem>>, vector<1x32xf32>
    %121 = vector.broadcast %120 : vector<1x32xf32> to vector<16x32xf32>
    %122 = arith.addf %119, %121 : vector<16x32xf32>
    %123 = arith.truncf %122 : vector<16x32xf32> to vector<16x32xbf16>
    %c0_31 = arith.constant 0 : index
    %c128 = arith.constant 128 : index
    %124 = vector.load %arg2[%c0_31, %c128] : memref<32x256xbf16, #tpu.memory_space<vmem>>, vector<32x128xbf16>
    %cst_32 = arith.constant dense<0.000000e+00> : vector<16x128xf32>
    %125 = tpu.matmul %123, %124, %cst_32 {dimension_numbers = #tpu.dot_dimension_numbers<[1], [0], [0], [1], [0, 0, 1, 1], [], []>} : vector<16x32xbf16>, vector<32x128xbf16>, vector<16x128xf32> -> vector<16x128xf32>
    %cst_33 = arith.constant 5.000000e-01 : f32
    %126 = vector.broadcast %cst_33 : f32 to vector<16x128xf32>
    %127 = arith.mulf %126, %125 : vector<16x128xf32>
    %cst_34 = arith.constant 0.707106769 : f32
    %128 = vector.broadcast %cst_34 : f32 to vector<16x128xf32>
    %129 = arith.mulf %125, %128 : vector<16x128xf32>
    %130 = math.erf %129 : vector<16x128xf32>
    %cst_35 = arith.constant 1.000000e+00 : f32
    %131 = vector.broadcast %cst_35 : f32 to vector<16x128xf32>
    %132 = arith.addf %131, %130 : vector<16x128xf32>
    %133 = arith.mulf %127, %132 : vector<16x128xf32>
    %134 = arith.truncf %133 : vector<16x128xf32> to vector<16x128xbf16>
    %c0_36 = arith.constant 0 : index
    %c0_37 = arith.constant 0 : index
    %135 = vector.load %arg3[%c0_36, %c0_37] : memref<128x32xbf16, #tpu.memory_space<vmem>>, vector<128x32xbf16>
    %cst_38 = arith.constant dense<0.000000e+00> : vector<16x32xf32>
    %136 = tpu.matmul %134, %135, %cst_38 {dimension_numbers = #tpu.dot_dimension_numbers<[1], [0], [0], [1], [0, 0, 1, 1], [], []>} : vector<16x128xbf16>, vector<128x32xbf16>, vector<16x32xf32> -> vector<16x32xf32>
    %137 = arith.addf %122, %136 : vector<16x32xf32>
    %138 = vector.shape_cast %137 : vector<16x32xf32> to vector<2x8x32xf32>
    %c0_39 = arith.constant 0 : index
    %c0_40 = arith.constant 0 : index
    %c0_41 = arith.constant 0 : index
    %139 = vector.load %arg5[%c0_39, %c0_40, %c0_41] : memref<2x8x32xf32, #tpu.memory_space<vmem>>, vector<2x8x32xf32>
    tpu.vector_store %arg5[%c0_39, %c0_40, %c0_41], %138 {strides = array<i32>} : memref<2x8x32xf32, #tpu.memory_space<vmem>>, vector<2x8x32xf32>,
    return
  }
  func.func @transform_0(%arg0: i32) -> (i32, i32, i32) {
    %c0_i32 = arith.constant 0 : i32
    %c0_i32_0 = arith.constant 0 : i32
    %c0_i32_1 = arith.constant 0 : i32
    return %arg0, %c0_i32, %c0_i32_0 : i32, i32, i32
  }
  func.func @transform_1(%arg0: i32) -> (i32, i32) {
    %c0_i32 = arith.constant 0 : i32
    %c0_i32_0 = arith.constant 0 : i32
    %c0_i32_1 = arith.constant 0 : i32
    return %c0_i32, %c0_i32_0 : i32, i32
  }
  func.func @transform_2(%arg0: i32) -> (i32, i32) {
    %c0_i32 = arith.constant 0 : i32
    %c0_i32_0 = arith.constant 0 : i32
    %c0_i32_1 = arith.constant 0 : i32
    return %c0_i32, %c0_i32_0 : i32, i32
  }
  func.func @transform_3(%arg0: i32) -> (i32, i32) {
    %c0_i32 = arith.constant 0 : i32
    %c0_i32_0 = arith.constant 0 : i32
    %c0_i32_1 = arith.constant 0 : i32
    return %c0_i32, %c0_i32_0 : i32, i32
  }
  func.func @transform_4(%arg0: i32) -> (i32, i32, i32) {
    %c0_i32 = arith.constant 0 : i32
    %c0_i32_0 = arith.constant 0 : i32
    %c0_i32_1 = arith.constant 0 : i32
    return %arg0, %c0_i32, %c0_i32_0 : i32, i32, i32
  }
}

</mosaic_0001>

<bundles_post_ra>
// kernel: tpu_custom_call.1
= control target key start
LH: loop header
LB: loop body
LE: loop exit
PB: predicated region body
PF: predicated region fallthrough
CT: control target
= control target key end

     0   :  { %vm21_vm0 = vcmask 261120   ;;  %s1931_s0 = inlined_call_operand.vmem [shape: f32[2,8,32], index: 0, kind: input, shape index: {}]   ;;  %s1932_s1 = inlined_call_operand.vmem [shape: bf16[32,256], index: 1, kind: input, shape index: {}]   ;;  %s1933_s2 = inlined_call_operand.vmem [shape: bf16[128,32], index: 2, kind: input, shape index: {}]   ;;  %s1934_s3 = inlined_call_operand.vmem [shape: f32[1,128], index: 3, kind: input, shape index: {}]   ;;  %s1935_s4 = inlined_call_operand.hbm [shape: f32[2,8,32], index: 4, kind: output, shape index: {}]  }
   0x1   :  { %v1688_v0 = vld [vmem:[%s1931_s0] sm:$0xff]  ;;  %v1693_v1 = vld [vmem:[%s1931_s0 + $0x8] sm:$0xff] }
   0x2   :  { %v22_v2 = vsel %vm21_vm0, %v1688_v0, 0.0  ;;  %v25_v3 = vsel %vm21_vm0, %v1693_v1, 0.0 }
   0x3   :  { %23 = vadd.xlane.f32.xlu0 %v22_v2 }
   0x7   :  { %26 = vadd.xlane.f32.xlu0 %v25_v3 }
   0x8   :  { %9 = vsyncpa [#allocation3], 0  ;;  %v1565_v14 = vld [vmem:[%s1932_s1 + $0x10] ss:$8 sps:$4 sm:$0xff]   ;;  %v1641_v15 = vmov 0.0   ;;  %vm1642_vm1 = vmmov 0  }
   0x9   :  { %1391 = vmatprep.subr.bf16.mxu0 %v1641_v15  ;;  %1395 = vmatprep.mubr.msk.bf16.mxu0 %vm1642_vm1, %v1641_v15  ;;  %v1566_v16 = vld [vmem:[%s1932_s1] ss:$8 sps:$4 sm:$0xff]   ;;  %s1643_s24 = smov 96   ;;  %vm122_vm2 = vcmask 64512   ;;  %s1645_s25 = smov 88   ;;  %vm247_vm3 = vcmask 1043456  }
   0xa   :  { %1392 = vmatpush3.bf16.msra.mxu0 %v1565_v14  ;;  %1411 = vmatprep.subr.bf16.mxu1 %v1641_v15  ;;  %v1723_v28 = vld [vmem:[%s1934_s3] ss:$0 sm:$0xff]  ;;  %s1644_s3 = smov 64   ;;  %s1646_s26 = smov 120   ;;  %vm1025_vm4 = vcmask 130048   ;;  %vm1028_vm5 = vcmask 195584  }
   0xb   :  { %1393 = vmatprep.subr.bf16.mxu0 %v1641_v15  ;;  %1413 = vmatprep.mubr.msk.bf16.mxu1 %vm1642_vm1, %v1641_v15  ;;  %s1647_s27 = smov 56   ;;  %s1648_s28 = smov 80  }
   0xc   :  { %s1649_s29 = smov 112   ;;  %s1650_s30 = smov 48  }
   0xd   :  { %s1651_s5 = smov 72   ;;  %s1652_s6 = smov 104  }
   0xe   :  { %1394 = vmatpush3.bf16.msra.mxu0 %v1566_v16  ;;  %s1653_s7 = smov 40   ;;  %s1654_s10 = smov 32  }
   0xf   :  { %1399 = vmatprep.subr.bf16.mxu0 %v1641_v15  ;;  %s1655_s11 = smov 8   ;;  %s1656_s12 = smov 16  }
  0x10   :  { %s1657_s15 = smov 24  }
  0x8c   :  { %v24_v4 = vpop.xlane.xlu0 %23 }
  0x8d   :  { %v29_v5 = vmul.f32 0.03125, %v24_v4 }
  0x8f   :  { %v31_v6 = vsub.f32 %v1688_v0, %v29_v5 }
  0x90   :  { %v27_v7 = vpop.xlane.xlu0 %26 }
  0x91   :  { %v30_v8 = vmul.f32 0.03125, %v27_v7  ;;  %v33_v9 = vmul.f32 %v31_v6, %v31_v6 }
  0x93   :  { %v32_v10 = vsub.f32 %v1693_v1, %v30_v8  ;;  %v35_v11 = vsel %vm21_vm0, %v33_v9, 0.0 }
  0x94   :  { %36 = vadd.xlane.f32.xlu1 %v35_v11 }
  0x95   :  { %v34_v12 = vmul.f32 %v32_v10, %v32_v10 }
  0x97   :  { %v38_v13 = vsel %vm21_vm0, %v34_v12, 0.0 }
  0x98   :  { %39 = vadd.xlane.f32.xlu1 %v38_v13 }
 0x11d   :  { %v37_v17 = vpop.xlane.xlu1 %36 }
 0x11e   :  { %v41_v18 = vmul.f32 0.03125, %v37_v17 }
 0x120   :  { %v43_v19 = vadd.f32 1e-05, %v41_v18 }
 0x121   :  { %v40_v20 = vpop.xlane.xlu1 %39 }
 0x122   :  { %v42_v21 = vmul.f32 0.03125, %v40_v20  ;;  %1579 = vrsqrt.f32 %v43_v19 }
 0x124   :  { %v44_v22 = vadd.f32 1e-05, %v42_v21 }
 0x126   :  { %1581 = vrsqrt.f32 %v44_v22 }
 0x12f   :  { %v1580_v23 = vpop.eup %1579 }
 0x130   :  { %v47_v25 = vmul.f32 %v1580_v23, %v31_v6 }
 0x133   :  { %v1582_v24 = vpop.eup %1581 }
 0x134   :  { %v48_v26 = vmul.f32 %v1582_v24, %v32_v10 }
 0x136   :  { %v49_v27 = vpack.c.bf16 %v48_v26, %v47_v25 }
 0x138   :  { %1396 = vmatmul.mubr.msk.bf16.vlgmr.msra.gmra.mxu0 %vm21_vm0, %v49_v27 }
 0x139   :  { %1401 = vmatprep.mubr.msk.bf16.mxu0 %vm1642_vm1, %v1641_v15 }
 0x1f8   :  { %v110_v29 = vpop.f32.mrf.mxu0 }
 0x1f9   :  { %v111_v30 = vadd.f32 %v1723_v28, %v110_v29 }
 0x1fa   :  { %v1397_v31 = vpop.f32.mrf.mxu0 }
 0x1fb   :  { %v1726_v32 = vpack.c.bf16 %v111_v30, %v111_v30 }
 0x1fc   :  { %v113_v33 = vpop.f32.mrf.mxu0 }
 0x1fd   :  { %v114_v34 = vadd.f32 %v1723_v28, %v113_v33  ;;  %120 = vrot.lane.b32.xlu0 %v1726_v32, %s1643_s24 }
 0x1fe   :  { %v1398_v35 = vpop.f32.mrf.mxu0 }
 0x1ff   :  { %v1730_v36 = vpack.c.bf16 %v114_v34, %v114_v34 }
 0x201   :  { %170 = vrot.lane.b32.xlu1 %v1730_v36, %s1643_s24 }
 0x26f   :  { %v121_v37 = vpop.permute.xlu0 %120 }
 0x270   :  { %v127_v38 = vsel %vm122_vm2, %v121_v37, 0 }
 0x271   :  { %1400 = vmatpush3.bf16.xpose.msra.mxu0 %v127_v38 }
 0x272   :  { %1405 = vmatprep.subr.bf16.mxu0 %v1641_v15 }
 0x273   :  { %v171_v39 = vpop.permute.xlu1 %170 }
 0x274   :  { %v176_v40 = vsel %vm122_vm2, %v171_v39, 0 }
 0x278   :  { %1402 = vmatmul.mubr.msk.bf16.vlgmr.msra.gmra.mxu0 %vm122_vm2, %v1726_v32 }
 0x279   :  { %1406 = vmatpush3.bf16.xpose.msra.mxu0 %v176_v40  ;;  %1407 = vmatprep.mubr.msk.bf16.mxu0 %vm1642_vm1, %v1641_v15 }
 0x27a   :  { %1417 = vmatprep.subr.bf16.mxu0 %v1641_v15 }
 0x280   :  { %1408 = vmatmul.mubr.msk.bf16.vlgmr.msra.gmra.mxu0 %vm122_vm2, %v1730_v36 }
 0x281   :  { %1419 = vmatprep.mubr.msk.bf16.mxu0 %vm1642_vm1, %v1641_v15 }
 0x338   :  { %v163_v41 = vpop.f32.mrf.mxu0 }
 0x339   :  { %v218_v42 = vsel %vm122_vm2, %v163_v41, -inf }
 0x33a   :  { %219 = vmax.xlane.f32.xlu1 %v218_v42  ;;  %v1403_v43 = vpop.f32.mrf.mxu0 }
 0x33c   :  { %v166_v44 = vpop.f32.mrf.mxu0 }
 0x33e   :  { %v1404_v45 = vpop.f32.mrf.mxu0 }
 0x340   :  { %v212_v46 = vpop.f32.mrf.mxu0 }
 0x341   :  { %v221_v47 = vsel %vm122_vm2, %v212_v46, -inf }
 0x342   :  { %222 = vmax.xlane.f32.xlu0 %v221_v47  ;;  %v1409_v48 = vpop.f32.mrf.mxu0 }
 0x344   :  { %v215_v49 = vpop.f32.mrf.mxu0 }
 0x346   :  { %v1410_v50 = vpop.f32.mrf.mxu0 }
 0x34b   :  { %291 = vrot.lane.b32.xlu1 %v1730_v36, %s1644_s3 }
 0x34f   :  { %341 = vrot.lane.b32.xlu1 %v1726_v32, %s1645_s25 }
 0x3c3   :  { %v220_v51 = vpop.xlane.xlu1 %219 }
 0x3c4   :  { %v224_v52 = vsub.f32 %v163_v41, %v220_v51 }
 0x3c6   :  { %v226_v53 = vmul.f32 1.442695, %v224_v52 }
 0x3c7   :  { %v292_v54 = vpop.permute.xlu1 %291 }
 0x3c8   :  { %1583 = vpow2.f32 %v226_v53  ;;  %v297_v55 = vsel %vm247_vm3, %v292_v54, 0 }
 0x3c9   :  { %1418 = vmatpush3.bf16.msra.mxu0 %v297_v55 }
 0x3ca   :  { %1429 = vmatprep.subr.bf16.mxu0 %v1641_v15 }
 0x3cb   :  { %v223_v56 = vpop.xlane.xlu0 %222  ;;  %v342_v2 = vpop.permute.xlu1 %341 }
 0x3cc   :  { %v225_v57 = vsub.f32 %v212_v46, %v223_v56  ;;  %v347_v9 = vsel %vm122_vm2, %v342_v2, 0 }
 0x3ce   :  { %v228_v58 = vmul.f32 1.442695, %v225_v57 }
 0x3d0   :  { %1585 = vpow2.f32 %v228_v58 }
 0x3d5   :  { %v1584_v59 = vpop.eup %1583 }
 0x3d6   :  { %v230_v60 = vsel %vm122_vm2, %v1584_v59, 0.0 }
 0x3d7   :  { %231 = vadd.xlane.f32.xlu0 %v230_v60 }
 0x3dd   :  { %v1586_v61 = vpop.eup %1585 }
 0x3de   :  { %v233_v62 = vsel %vm122_vm2, %v1586_v61, 0.0 }
 0x3df   :  { %234 = vadd.xlane.f32.xlu1 %v233_v62 }
 0x3ed   :  { %242 = vrot.lane.b32.xlu0 %v1726_v32, %s1644_s3 }
 0x3f0   :  { %391 = vrot.lane.b32.xlu1 %v1730_v36, %s1645_s25 }
 0x3f1   :  { %339 = vrot.lane.b32.xlu0 %v1726_v32, %s1646_s26 }
 0x3f4   :  { %389 = vrot.lane.b32.xlu1 %v1730_v36, %s1646_s26 }
 0x460   :  { %v232_v63 = vpop.xlane.xlu0 %231 }
 0x461   :  { %1587 = vrcp.f32 %v232_v63 }
 0x464   :  { %v243_v3 = vpop.permute.xlu0 %242 }
 0x465   :  { %v249_v4 = vsel %vm247_vm3, %v243_v3, 0 }
 0x466   :  { %1412 = vmatpush3.bf16.msra.mxu1 %v249_v4 }
 0x467   :  { %1423 = vmatprep.subr.bf16.mxu1 %v1641_v15 }
 0x468   :  { %v235_v5 = vpop.xlane.xlu1 %234  ;;  %v340_v14 = vpop.permute.xlu0 %339 }
 0x469   :  { %1589 = vrcp.f32 %v235_v5 }
 0x46c   :  { %v392_v12 = vpop.permute.xlu1 %391 }
 0x46d   :  { %v397_v16 = vsel %vm122_vm2, %v392_v12, 0 }
 0x46e   :  { %v1588_v6 = vpop.eup %1587 }
 0x46f   :  { %v238_v7 = vmul.f32 %v1588_v6, %v1584_v59 }
 0x470   :  { %v390_v17 = vpop.permute.xlu1 %389 }
 0x471   :  { %v240_v8 = vpack.c.bf16 %v238_v7, %v238_v7 }
 0x473   :  { %1414 = vmatmul.mubr.msk.bf16.vlgmr.msra.gmra.mxu1 %vm122_vm2, %v240_v8 }
 0x474   :  { %1424 = vmatpush3.bf16.xpose.msra.mxu1 %v347_v9  ;;  %1425 = vmatprep.mubr.msk.bf16.mxu1 %vm1642_vm1, %v1641_v15 }
 0x475   :  { %1435 = vmatprep.subr.bf16.mxu1 %v1641_v15 }
 0x476   :  { %v1590_v10 = vpop.eup %1589 }
 0x477   :  { %v239_v11 = vmul.f32 %v1590_v10, %v1586_v61 }
 0x479   :  { %v241_v13 = vpack.c.bf16 %v239_v11, %v239_v11 }
 0x47b   :  { %1420 = vmatmul.mubr.msk.bf16.vlgmr.msra.gmra.mxu0 %vm122_vm2, %v241_v13  ;;  %1426 = vmatmul.mubr.msk.bf16.vlgmr.msra.gmra.mxu1 %vm122_vm2, %v340_v14 }
 0x47c   :  { %1430 = vmatpush3.bf16.xpose.msra.mxu0 %v397_v16  ;;  %1431 = vmatprep.mubr.msk.bf16.mxu0 %vm1642_vm1, %v1641_v15 }
 0x47d   :  { %1441 = vmatprep.subr.bf16.mxu0 %v1641_v15  ;;  %1437 = vmatprep.mubr.msk.bf16.mxu1 %vm1642_vm1, %v1641_v15 }
 0x483   :  { %1432 = vmatmul.mubr.msk.bf16.vlgmr.msra.gmra.mxu0 %vm122_vm2, %v390_v17 }
 0x484   :  { %1443 = vmatprep.mubr.msk.bf16.mxu0 %vm1642_vm1, %v1641_v15 }
 0x533   :  { %v1775_v18 = vpop.f32.mrf.mxu1 }
 0x535   :  { %v1415_v19 = vpop.f32.mrf.mxu1 }
 0x537   :  { %v288_v20 = vpop.f32.mrf.mxu1 }
 0x539   :  { %v1416_v21 = vpop.f32.mrf.mxu1 }
 0x53b   :  { %v1777_v22 = vpop.f32.mrf.mxu0  ;;  %v383_v23 = vpop.f32.mrf.mxu1 }
 0x53c   :  { %v439_v24 = vsel %vm122_vm2, %v383_v23, -inf }
 0x53d   :  { %440 = vmax.xlane.f32.xlu0 %v439_v24  ;;  %v1421_v25 = vpop.f32.mrf.mxu0  ;;  %v1427_v26 = vpop.f32.mrf.mxu1 }
 0x53f   :  { %v336_v27 = vpop.f32.mrf.mxu0  ;;  %v386_v29 = vpop.f32.mrf.mxu1 }
 0x541   :  { %v1422_v30 = vpop.f32.mrf.mxu0  ;;  %v1428_v31 = vpop.f32.mrf.mxu1 }
 0x543   :  { %v433_v33 = vpop.f32.mrf.mxu0 }
 0x544   :  { %v442_v34 = vsel %vm122_vm2, %v433_v33, -inf }
 0x545   :  { %443 = vmax.xlane.f32.xlu1 %v442_v34  ;;  %v1433_v35 = vpop.f32.mrf.mxu0 }
 0x547   :  { %v436_v37 = vpop.f32.mrf.mxu0 }
 0x549   :  { %v1434_v38 = vpop.f32.mrf.mxu0 }
 0x556   :  { %511 = vrot.lane.b32.xlu1 %v1730_v36, %s1647_s27 }
 0x55a   :  { %561 = vrot.lane.b32.xlu1 %v1726_v32, %s1648_s28 }
 0x55e   :  { %611 = vrot.lane.b32.xlu1 %v1730_v36, %s1648_s28 }
 0x562   :  { %609 = vrot.lane.b32.xlu1 %v1730_v36, %s1649_s29 }
 0x5c6   :  { %v441_v39 = vpop.xlane.xlu0 %440 }
 0x5c7   :  { %v445_v40 = vsub.f32 %v383_v23, %v441_v39 }
 0x5c9   :  { %v447_v41 = vmul.f32 1.442695, %v445_v40 }
 0x5cb   :  { %1591 = vpow2.f32 %v447_v41 }
 0x5ce   :  { %v444_v42 = vpop.xlane.xlu1 %443 }
 0x5cf   :  { %v446_v43 = vsub.f32 %v433_v33, %v444_v42 }
 0x5d1   :  { %v449_v44 = vmul.f32 1.442695, %v446_v43 }
 0x5d2   :  { %v512_v45 = vpop.permute.xlu1 %511 }
 0x5d3   :  { %1593 = vpow2.f32 %v449_v44  ;;  %v517_v46 = vsel %vm247_vm3, %v512_v45, 0 }
 0x5d4   :  { %1442 = vmatpush3.bf16.msra.mxu0 %v517_v46 }
 0x5d5   :  { %1453 = vmatprep.subr.bf16.mxu0 %v1641_v15 }
 0x5d6   :  { %v562_v57 = vpop.permute.xlu1 %561 }
 0x5d7   :  { %v567_v59 = vsel %vm122_vm2, %v562_v57, 0 }
 0x5d8   :  { %v1592_v47 = vpop.eup %1591 }
 0x5d9   :  { %v451_v48 = vsel %vm122_vm2, %v1592_v47, 0.0 }
 0x5da   :  { %452 = vadd.xlane.f32.xlu0 %v451_v48  ;;  %v612_v62 = vpop.permute.xlu1 %611 }
 0x5db   :  { %v617_v3 = vsel %vm122_vm2, %v612_v62, 0 }
 0x5de   :  { %v610_v4 = vpop.permute.xlu1 %609 }
 0x5e0   :  { %v1594_v49 = vpop.eup %1593 }
 0x5e1   :  { %v454_v50 = vsel %vm122_vm2, %v1594_v49, 0.0 }
 0x5e2   :  { %455 = vadd.xlane.f32.xlu0 %v454_v50 }
 0x5f8   :  { %463 = vrot.lane.b32.xlu0 %v1726_v32, %s1647_s27 }
 0x5fc   :  { %559 = vrot.lane.b32.xlu0 %v1726_v32, %s1649_s29 }
 0x663   :  { %v453_v51 = vpop.xlane.xlu0 %452 }
 0x664   :  { %1595 = vrcp.f32 %v453_v51 }
 0x66b   :  { %v456_v52 = vpop.xlane.xlu0 %455 }
 0x66c   :  { %1597 = vrcp.f32 %v456_v52 }
 0x66f   :  { %v464_v53 = vpop.permute.xlu0 %463 }
 0x670   :  { %v469_v54 = vsel %vm247_vm3, %v464_v53, 0 }
 0x671   :  { %v1596_v55 = vpop.eup %1595  ;;  %1436 = vmatpush3.bf16.msra.mxu1 %v469_v54 }
 0x672   :  { %1447 = vmatprep.subr.bf16.mxu1 %v1641_v15  ;;  %v459_v56 = vmul.f32 %v1596_v55, %v1592_v47 }
 0x673   :  { %v560_v2 = vpop.permute.xlu0 %559 }
 0x674   :  { %v461_v58 = vpack.c.bf16 %v459_v56, %v459_v56 }
 0x676   :  { %1438 = vmatmul.mubr.msk.bf16.vlgmr.msra.gmra.mxu1 %vm122_vm2, %v461_v58 }
 0x677   :  { %1448 = vmatpush3.bf16.xpose.msra.mxu1 %v567_v59  ;;  %1449 = vmatprep.mubr.msk.bf16.mxu1 %vm1642_vm1, %v1641_v15 }
 0x678   :  { %1459 = vmatprep.subr.bf16.mxu1 %v1641_v15 }
 0x679   :  { %v1598_v60 = vpop.eup %1597 }
 0x67a   :  { %v460_v61 = vmul.f32 %v1598_v60, %v1594_v49 }
 0x67c   :  { %v462_v63 = vpack.c.bf16 %v460_v61, %v460_v61 }
 0x67e   :  { %1444 = vmatmul.mubr.msk.bf16.vlgmr.msra.gmra.mxu0 %vm122_vm2, %v462_v63  ;;  %1450 = vmatmul.mubr.msk.bf16.vlgmr.msra.gmra.mxu1 %vm122_vm2, %v560_v2 }
 0x67f   :  { %1454 = vmatpush3.bf16.xpose.msra.mxu0 %v617_v3  ;;  %1455 = vmatprep.mubr.msk.bf16.mxu0 %vm1642_vm1, %v1641_v15 }
 0x680   :  { %1465 = vmatprep.subr.bf16.mxu0 %v1641_v15  ;;  %1461 = vmatprep.mubr.msk.bf16.mxu1 %vm1642_vm1, %v1641_v15 }
 0x686   :  { %1456 = vmatmul.mubr.msk.bf16.vlgmr.msra.gmra.mxu0 %vm122_vm2, %v610_v4 }
 0x687   :  { %1467 = vmatprep.mubr.msk.bf16.mxu0 %vm1642_vm1, %v1641_v15 }
 0x736   :  { %v1809_v5 = vpop.f32.mrf.mxu1 }
 0x738   :  { %v1439_v6 = vpop.f32.mrf.mxu1 }
 0x73a   :  { %v508_v7 = vpop.f32.mrf.mxu1 }
 0x73c   :  { %v1440_v8 = vpop.f32.mrf.mxu1 }
 0x73e   :  { %v1811_v9 = vpop.f32.mrf.mxu0  ;;  %v603_v10 = vpop.f32.mrf.mxu1 }
 0x73f   :  { %v1550_v11 = vpack.i.bf16 %v1811_v9, %v1809_v5  ;;  %v659_v12 = vsel %vm122_vm2, %v603_v10, -inf }
 0x740   :  { %660 = vmax.xlane.f32.xlu0 %v659_v12  ;;  %v1445_v13 = vpop.f32.mrf.mxu0  ;;  %v1451_v14 = vpop.f32.mrf.mxu1 }
 0x742   :  { %v556_v16 = vpop.f32.mrf.mxu0  ;;  %v606_v17 = vpop.f32.mrf.mxu1 }
 0x744   :  { %v1446_v19 = vpop.f32.mrf.mxu0  ;;  %v1452_v20 = vpop.f32.mrf.mxu1 }
 0x745   :  { %v1567_v20 = vld [vmem:[%s1932_s1 + $0x10] ss:$8 sps:$4 sm:$0xff]  }
 0x746   :  { %v653_v21 = vpop.f32.mrf.mxu0 }
 0x747   :  { %v662_v23 = vsel %vm122_vm2, %v653_v21, -inf }
 0x748   :  { %663 = vmax.xlane.f32.xlu1 %v662_v23  ;;  %v1457_v24 = vpop.f32.mrf.mxu0 }
 0x74a   :  { %v656_v25 = vpop.f32.mrf.mxu0 }
 0x74c   :  { %v1458_v26 = vpop.f32.mrf.mxu0 }
 0x759   :  { %731 = vrot.lane.b32.xlu1 %v1730_v36, %s1650_s30 }
 0x75d   :  { %781 = vrot.lane.b32.xlu1 %v1726_v32, %s1651_s5 }
 0x761   :  { %831 = vrot.lane.b32.xlu1 %v1730_v36, %s1651_s5 }
 0x765   :  { %829 = vrot.lane.b32.xlu1 %v1730_v36, %s1652_s6 }
 0x7c9   :  { %v661_v27 = vpop.xlane.xlu0 %660 }
 0x7ca   :  { %v665_v29 = vsub.f32 %v603_v10, %v661_v27 }
 0x7cc   :  { %v667_v30 = vmul.f32 1.442695, %v665_v29 }
 0x7ce   :  { %1599 = vpow2.f32 %v667_v30 }
 0x7d1   :  { %v664_v31 = vpop.xlane.xlu1 %663 }
 0x7d2   :  { %v666_v33 = vsub.f32 %v653_v21, %v664_v31 }
 0x7d4   :  { %v669_v34 = vmul.f32 1.442695, %v666_v33 }
 0x7d5   :  { %v732_v35 = vpop.permute.xlu1 %731 }
 0x7d6   :  { %1601 = vpow2.f32 %v669_v34  ;;  %v737_v37 = vsel %vm247_vm3, %v732_v35, 0 }
 0x7d7   :  { %1466 = vmatpush3.bf16.msra.mxu0 %v737_v37 }
 0x7d8   :  { %1477 = vmatprep.subr.bf16.mxu0 %v1641_v15 }
 0x7d9   :  { %v782_v48 = vpop.permute.xlu1 %781 }
 0x7da   :  { %v787_v50 = vsel %vm122_vm2, %v782_v48, 0 }
 0x7db   :  { %v1600_v38 = vpop.eup %1599 }
 0x7dc   :  { %v671_v39 = vsel %vm122_vm2, %v1600_v38, 0.0 }
 0x7dd   :  { %672 = vadd.xlane.f32.xlu0 %v671_v39  ;;  %v832_v53 = vpop.permute.xlu1 %831 }
 0x7de   :  { %v837_v56 = vsel %vm122_vm2, %v832_v53, 0 }
 0x7e1   :  { %v830_v57 = vpop.permute.xlu1 %829 }
 0x7e3   :  { %v1602_v40 = vpop.eup %1601 }
 0x7e4   :  { %v674_v41 = vsel %vm122_vm2, %v1602_v40, 0.0 }
 0x7e5   :  { %675 = vadd.xlane.f32.xlu0 %v674_v41 }
 0x7fb   :  { %683 = vrot.lane.b32.xlu0 %v1726_v32, %s1650_s30 }
 0x7ff   :  { %779 = vrot.lane.b32.xlu0 %v1726_v32, %s1652_s6 }
 0x866   :  { %v673_v42 = vpop.xlane.xlu0 %672 }
 0x867   :  { %1603 = vrcp.f32 %v673_v42 }
 0x86e   :  { %v676_v43 = vpop.xlane.xlu0 %675 }
 0x86f   :  { %1605 = vrcp.f32 %v676_v43  ;;  %v1568_v43 = vld [vmem:[%s1932_s1] ss:$8 sps:$4 sm:$0xff]  }
 0x872   :  { %v684_v44 = vpop.permute.xlu0 %683 }
 0x873   :  { %v689_v45 = vsel %vm247_vm3, %v684_v44, 0 }
 0x874   :  { %v1604_v46 = vpop.eup %1603  ;;  %1460 = vmatpush3.bf16.msra.mxu1 %v689_v45 }
 0x875   :  { %1471 = vmatprep.subr.bf16.mxu1 %v1641_v15  ;;  %v679_v47 = vmul.f32 %v1604_v46, %v1600_v38 }
 0x876   :  { %v780_v55 = vpop.permute.xlu0 %779 }
 0x877   :  { %v681_v49 = vpack.c.bf16 %v679_v47, %v679_v47 }
 0x879   :  { %1462 = vmatmul.mubr.msk.bf16.vlgmr.msra.gmra.mxu1 %vm122_vm2, %v681_v49 }
 0x87a   :  { %1472 = vmatpush3.bf16.xpose.msra.mxu1 %v787_v50  ;;  %1473 = vmatprep.mubr.msk.bf16.mxu1 %vm1642_vm1, %v1641_v15 }
 0x87b   :  { %1483 = vmatprep.subr.bf16.mxu1 %v1641_v15 }
 0x87c   :  { %v1606_v51 = vpop.eup %1605 }
 0x87d   :  { %v680_v52 = vmul.f32 %v1606_v51, %v1602_v40 }
 0x87f   :  { %v682_v54 = vpack.c.bf16 %v680_v52, %v680_v52 }
 0x881   :  { %1468 = vmatmul.mubr.msk.bf16.vlgmr.msra.gmra.mxu0 %vm122_vm2, %v682_v54  ;;  %1474 = vmatmul.mubr.msk.bf16.vlgmr.msra.gmra.mxu1 %vm122_vm2, %v780_v55 }
 0x882   :  { %1478 = vmatpush3.bf16.xpose.msra.mxu0 %v837_v56  ;;  %1479 = vmatprep.mubr.msk.bf16.mxu0 %vm1642_vm1, %v1641_v15 }
 0x883   :  { %1489 = vmatprep.subr.bf16.mxu0 %v1641_v15  ;;  %1485 = vmatprep.mubr.msk.bf16.mxu1 %vm1642_vm1, %v1641_v15 }
 0x889   :  { %1480 = vmatmul.mubr.msk.bf16.vlgmr.msra.gmra.mxu0 %vm122_vm2, %v830_v57 }
 0x88a   :  { %1491 = vmatprep.mubr.msk.bf16.mxu0 %vm1642_vm1, %v1641_v15 }
 0x939   :  { %v725_v58 = vpop.f32.mrf.mxu1 }
 0x93b   :  { %v1463_v59 = vpop.f32.mrf.mxu1 }
 0x93d   :  { %v728_v60 = vpop.f32.mrf.mxu1 }
 0x93f   :  { %v1464_v61 = vpop.f32.mrf.mxu1 }
 0x941   :  { %v773_v62 = vpop.f32.mrf.mxu0  ;;  %v823_v63 = vpop.f32.mrf.mxu1 }
 0x942   :  { %v1555_v2 = vpack.i.bf16 %v773_v62, %v725_v58  ;;  %v879_v3 = vsel %vm122_vm2, %v823_v63, -inf }
 0x943   :  { %880 = vmax.xlane.f32.xlu0 %v879_v3  ;;  %v1469_v4 = vpop.f32.mrf.mxu0  ;;  %v1475_v6 = vpop.f32.mrf.mxu1 }
 0x945   :  { %v776_v7 = vpop.f32.mrf.mxu0  ;;  %v826_v8 = vpop.f32.mrf.mxu1 }
 0x946   :  { %v1569_v8 = vld [vmem:[%s1932_s1 + $0x14] ss:$8 sps:$4 sm:$0xff]  }
 0x947   :  { %v1470_v10 = vpop.f32.mrf.mxu0  ;;  %v1476_v12 = vpop.f32.mrf.mxu1 }
 0x949   :  { %v873_v13 = vpop.f32.mrf.mxu0 }
 0x94a   :  { %v882_v14 = vsel %vm122_vm2, %v873_v13, -inf }
 0x94b   :  { %883 = vmax.xlane.f32.xlu1 %v882_v14  ;;  %v1481_v16 = vpop.f32.mrf.mxu0 }
 0x94d   :  { %v876_v17 = vpop.f32.mrf.mxu0 }
 0x94f   :  { %v1482_v19 = vpop.f32.mrf.mxu0 }
 0x95c   :  { %951 = vrot.lane.b32.xlu1 %v1730_v36, %s1653_s7 }
 0x960   :  { %1048 = vrot.lane.b32.xlu1 %v1567_v20, %s1654_s10 }
 0x964   :  { %1551 = vrot.lane.b32.xlu1 %v1550_v11, %s1655_s11 }
 0x9cc   :  { %v881_v21 = vpop.xlane.xlu0 %880 }
 0x9cd   :  { %v885_v23 = vsub.f32 %v823_v63, %v881_v21 }
 0x9cf   :  { %v887_v24 = vmul.f32 1.442695, %v885_v23 }
 0x9d1   :  { %1607 = vpow2.f32 %v887_v24  ;;  %v1572_v24 = vld [vmem:[%s1933_s2 + $0x30] sm:$0xff]  }
 0x9d4   :  { %v884_v25 = vpop.xlane.xlu1 %883 }
 0x9d5   :  { %v886_v26 = vsub.f32 %v873_v13, %v884_v25  ;;  %v1575_v25 = vld [vmem:[%s1933_s2 + $0x18] sm:$0xff]  }
 0x9d7   :  { %v889_v36 = vmul.f32 1.442695, %v886_v26  ;;  %v1576_v26 = vld [vmem:[%s1933_s2 + $0x10] sm:$0xff]  }
 0x9d8   :  { %v952_v27 = vpop.permute.xlu1 %951 }
 0x9d9   :  { %1609 = vpow2.f32 %v889_v36  ;;  %v957_v29 = vsel %vm247_vm3, %v952_v27, 0  ;;  %v1577_v36 = vld [vmem:[%s1933_s2 + $0x8] sm:$0xff]   ;;  %v1578_v27 = vld [vmem:[%s1933_s2] sm:$0xff]  }
 0x9da   :  { %1490 = vmatpush3.bf16.msra.mxu0 %v957_v29 }
 0x9db   :  { %1503 = vmatprep.subr.bf16.mxu0 %v1641_v15 }
 0x9dc   :  { %v1049_v40 = vpop.permute.xlu1 %1048 }
 0x9de   :  { %v1608_v30 = vpop.eup %1607 }
 0x9df   :  { %v891_v31 = vsel %vm122_vm2, %v1608_v30, 0.0 }
 0x9e0   :  { %892 = vadd.xlane.f32.xlu0 %v891_v31  ;;  %v1552_v55 = vpop.permute.xlu1 %1551 }
 0x9e1   :  { %v1554_v56 = vunpack.i.h.bf16 %v1552_v55  ;;  %v1553_v57 = vunpack.i.l.bf16 %v1552_v55 }
 0x9e3   :  { %v1024_v61 = vsel %vm122_vm2, %v1777_v22, %v1554_v56  ;;  %v1023_v62 = vsel %vm122_vm2, %v1775_v18, %v1553_v57  ;;  %v1570_v18 = vld [vmem:[%s1932_s1 + $0x4] ss:$8 sps:$4 sm:$0xff]   ;;  %v1571_v22 = vld [vmem:[%s1933_s2 + $0x38] sm:$0xff]  }
 0x9e6   :  { %v1610_v5 = vpop.eup %1609 }
 0x9e7   :  { %v894_v9 = vsel %vm122_vm2, %v1610_v5, 0.0 }
 0x9e8   :  { %895 = vadd.xlane.f32.xlu0 %v894_v9 }
 0x9fe   :  { %903 = vrot.lane.b32.xlu0 %v1726_v32, %s1653_s7 }
 0xa02   :  { %1556 = vrot.lane.b32.xlu0 %v1555_v2, %s1656_s12 }
 0xa06   :  { %1046 = vrot.lane.b32.xlu0 %v1568_v43, %s1654_s10 }
 0xa69   :  { %v893_v11 = vpop.xlane.xlu0 %892 }
 0xa6a   :  { %1611 = vrcp.f32 %v893_v11 }
 0xa71   :  { %v896_v33 = vpop.xlane.xlu0 %895 }
 0xa72   :  { %1613 = vrcp.f32 %v896_v33 }
 0xa75   :  { %v904_v34 = vpop.permute.xlu0 %903 }
 0xa76   :  { %v909_v35 = vsel %vm247_vm3, %v904_v34, 0 }
 0xa77   :  { %v1612_v37 = vpop.eup %1611  ;;  %1484 = vmatpush3.bf16.msra.mxu1 %v909_v35 }
 0xa78   :  { %v899_v38 = vmul.f32 %v1612_v37, %v1608_v30  ;;  %1495 = vmatprep.subr.bf16.mxu1 %v1641_v15 }
 0xa79   :  { %v1557_v44 = vpop.permute.xlu0 %1556 }
 0xa7a   :  { %v901_v39 = vpack.c.bf16 %v899_v38, %v899_v38  ;;  %v1559_v58 = vunpack.i.h.bf16 %v1557_v44  ;;  %v1558_v59 = vunpack.i.l.bf16 %v1557_v44 }
 0xa7c   :  { %1486 = vmatmul.mubr.msk.bf16.vlgmr.msra.gmra.mxu1 %vm122_vm2, %v901_v39  ;;  %v1026_v3 = vsel %vm1025_vm4, %v1023_v62, %v1558_v59  ;;  %v1027_v4 = vsel %vm1025_vm4, %v1024_v61, %v1559_v58 }
 0xa7d   :  { %1496 = vmatpush3.bf16.msra.mxu1 %v1049_v40  ;;  %1499 = vmatprep.mubr.msk.bf16.mxu1 %vm1642_vm1, %v1641_v15  ;;  %v1047_v46 = vpop.permute.xlu0 %1046 }
 0xa7e   :  { %1497 = vmatprep.subr.bf16.mxu1 %v1641_v15 }
 0xa7f   :  { %v1614_v32 = vpop.eup %1613 }
 0xa80   :  { %v900_v41 = vmul.f32 %v1614_v32, %v1610_v5 }
 0xa81   :  { %1498 = vmatpush3.bf16.msra.mxu1 %v1047_v46 }
 0xa82   :  { %v902_v42 = vpack.c.bf16 %v900_v41, %v900_v41  ;;  %1511 = vmatprep.subr.bf16.mxu1 %v1641_v15 }
 0xa84   :  { %1492 = vmatmul.mubr.msk.bf16.vlgmr.msra.gmra.mxu0 %vm122_vm2, %v902_v42 }
 0xa85   :  { %1507 = vmatprep.mubr.msk.bf16.mxu0 %vm1642_vm1, %v1641_v15  ;;  %1504 = vmatpush3.bf16.msra.mxu0 %v1569_v8 }
 0xa86   :  { %1505 = vmatprep.subr.bf16.mxu0 %v1641_v15 }
 0xa89   :  { %1506 = vmatpush3.bf16.msra.mxu0 %v1570_v18 }
 0xb3c   :  { %v945_v45 = vpop.f32.mrf.mxu1 }
 0xb3e   :  { %v1487_v47 = vpop.f32.mrf.mxu1 }
 0xb40   :  { %v948_v48 = vpop.f32.mrf.mxu1 }
 0xb42   :  { %v1488_v49 = vpop.f32.mrf.mxu1 }
 0xb44   :  { %v993_v50 = vpop.f32.mrf.mxu0 }
 0xb45   :  { %v1560_v51 = vpack.i.bf16 %v993_v50, %v945_v45 }
 0xb46   :  { %v1493_v52 = vpop.f32.mrf.mxu0 }
 0xb47   :  { %1561 = vrot.lane.b32.xlu1 %v1560_v51, %s1657_s15 }
 0xb48   :  { %v996_v53 = vpop.f32.mrf.mxu0 }
 0xb4a   :  { %v1494_v54 = vpop.f32.mrf.mxu0 }
 0xb4b   :  { %1104 = vrot.lane.b32.xlu1 %v1723_v28, %s1654_s10 }
 0xbb9   :  { %v1562_v60 = vpop.permute.xlu1 %1561 }
 0xbba   :  { %v1564_v63 = vunpack.i.h.bf16 %v1562_v60  ;;  %v1563_v2 = vunpack.i.l.bf16 %v1562_v60 }
 0xbbc   :  { %v1030_v6 = vsel %vm1028_vm5, %v1027_v4, %v1564_v63  ;;  %v1029_v28 = vsel %vm1028_vm5, %v1026_v3, %v1563_v2 }
 0xbbd   :  { %v1031_v7 = vpack.c.bf16 %v1030_v6, %v1029_v28  ;;  %v1105_v14 = vpop.permute.xlu1 %1104 }
 0xbbf   :  { %1500 = vmatmul.mubr.msk.bf16.vlgmr.msra.gmra.mxu1 %vm21_vm0, %v1031_v7 }
 0xbc0   :  { %1527 = vmatprep.mubr.msk.bf16.mxu1 %vm1642_vm1, %v1641_v15  ;;  %1512 = vmatpush3.bf16.msra.mxu1 %v1571_v22 }
 0xbc1   :  { %1513 = vmatprep.subr.bf16.mxu1 %v1641_v15 }
 0xbc4   :  { %1514 = vmatpush3.bf16.msra.mxu1 %v1572_v24 }
 0xbc5   :  { %1515 = vmatprep.subr.bf16.mxu1 %v1641_v15 }
 0xc7f   :  { %v1089_v10 = vpop.f32.mrf.mxu1 }
 0xc80   :  { %v1096_v13 = vadd.f32 %v1089_v10, %v1688_v0  ;;  %v1573_v0 = vld [vmem:[%s1933_s2 + $0x28] sm:$0xff]  }
 0xc81   :  { %v1501_v12 = vpop.f32.mrf.mxu1  ;;  %1516 = vmatpush3.bf16.msra.mxu1 %v1573_v0 }
 0xc82   :  { %v1107_v20 = vadd.f32 %v1105_v14, %v1096_v13  ;;  %1517 = vmatprep.subr.bf16.mxu1 %v1641_v15 }
 0xc83   :  { %v1092_v16 = vpop.f32.mrf.mxu1 }
 0xc84   :  { %v1097_v17 = vadd.f32 %v1092_v16, %v1693_v1  ;;  %v1574_v1 = vld [vmem:[%s1933_s2 + $0x20] sm:$0xff]   ;;  %s1658_s2 = smov [#allocation2]  }
 0xc85   :  { %v1502_v19 = vpop.f32.mrf.mxu1  ;;  %1518 = vmatpush3.bf16.msra.mxu1 %v1574_v1  ;;  %s1295_s7 = sshll.u32 %s1658_s2, 4  ;;  %s1296_s7 = int_to_ptr.vmem [resolvable:$true] %s1295_s7 }
 0xc86   :  { %v1108_v21 = vadd.f32 %v1105_v14, %v1097_v17  ;;  %1519 = vmatprep.subr.bf16.mxu1 %v1641_v15  ;;  %s1619_s8 = scalar_lea.vmem %s1296_s7, 256  ;;  %p1624_p1 = scmp.lt.s32.totalorder %s1296_s7, %s1296_s7 }
 0xc87   :  { %p1620_p0 = scmp.ne.s32.totalorder %s1296_s7, %s1619_s8  ;;  %p1625_p2 = scmp.lt.s32.totalorder %s1619_s8, %s1619_s8 }
 0xc88   :  { %v1109_v23 = vpack.c.bf16 %v1108_v21, %v1107_v20 }
 0xc89   :  { %1520 = vmatpush3.bf16.msra.mxu1 %v1575_v25  ;;  %p1626_p3 = por %p1625_p2, %p1624_p1 }
 0xc8a   :  { %1508 = vmatmul.mubr.msk.bf16.vlgmr.msra.gmra.mxu0 %vm21_vm0, %v1109_v23  ;;  %1521 = vmatprep.subr.bf16.mxu1 %v1641_v15 }
 0xc8b   :  { %p1627_p4 = pnand %p1626_p3, %p1620_p0 }
 0xc8d   :  { %1522 = vmatpush3.bf16.msra.mxu1 %v1576_v26 }
 0xc8e   :  { %1523 = vmatprep.subr.bf16.mxu1 %v1641_v15 }
 0xc91   :  { %1524 = vmatpush3.bf16.msra.mxu1 %v1577_v36 }
 0xc92   :  { %1525 = vmatprep.subr.bf16.mxu1 %v1641_v15 }
 0xc95   :  { %1526 = vmatpush3.bf16.msra.mxu1 %v1578_v27 }
 0xd4a   :  { %v1163_v29 = vpop.f32.mrf.mxu0 }
 0xd4b   :  { %v1172_v30 = vmul.f32 0.70710677, %v1163_v29  ;;  %v1170_v37 = vmul.f32 0.5, %v1163_v29 }
 0xd4c   :  { %v1509_v31 = vpop.f32.mrf.mxu0 }
 0xd4d   :  { %1615 = verf.f32 %v1172_v30 }
 0xd4e   :  { %v1166_v5 = vpop.f32.mrf.mxu0 }
 0xd4f   :  { %v1173_v9 = vmul.f32 0.70710677, %v1166_v5  ;;  %v1171_v38 = vmul.f32 0.5, %v1166_v5 }
 0xd50   :  { %v1510_v11 = vpop.f32.mrf.mxu0 }
 0xd51   :  { %1617 = verf.f32 %v1173_v9 }
 0xd5a   :  { %v1616_v33 = vpop.eup %1615 }
 0xd5b   :  { %v1176_v34 = vadd.f32 1.0, %v1616_v33 }
 0xd5d   :  { %v1178_v15 = vmul.f32 %v1176_v34, %v1170_v37 }
 0xd5e   :  { %v1618_v35 = vpop.eup %1617 }
 0xd5f   :  { %v1177_v39 = vadd.f32 1.0, %v1618_v35 }
 0xd61   :  { %v1179_v40 = vmul.f32 %v1177_v39, %v1171_v38 }
 0xd63   :  { %v1180_v32 = vpack.c.bf16 %v1179_v40, %v1178_v15 }
 0xd65   :  { %1528 = vmatmul.mubr.bf16.vlgmr.msra.gmra.mxu1 %v1180_v32 }
 0xe25   :  { %v1279_v41 = vpop.f32.mrf.mxu1 }
 0xe26   :  { %v1286_v42 = vadd.f32 %v1279_v41, %v1107_v20 }
 0xe27   :  { %v1529_v43 = vpop.f32.mrf.mxu1 }
 0xe28   :  { %1288 = vst.msk [vmem:[#allocation2] sm:$0xff] %vm21_vm0, %v1286_v42 }
 0xe29   :  { %v1282_v44 = vpop.f32.mrf.mxu1 }
 0xe2a   :  { %v1287_v45 = vadd.f32 %v1282_v44, %v1108_v21 }
 0xe2b   :  { %v1530_v46 = vpop.f32.mrf.mxu1 }
 0xe2c   :  { %1289 = vst.msk [vmem:[#allocation2 + $0x8] sm:$0xff] %vm21_vm0, %v1287_v45 }
 0xe2d   :  { %1630 = shalt.err (!%p1627_p4)
}
 0xe2e   :  { %s1659_s9 = smov 128  }
 0xe2f   :  { %1301 = dma.vmem_to_hbm [thread:$0]  %s1296_s7, 256, %s1935_s4, [#allocation3], %s1659_s9, %s1659_s9, %s1655_s11  }
 0xe30   :  { %1639 = dma.done.wait [#allocation3], 256  }
 0xe31   :  { %1640 = vsyncadd [#allocation3], 4294967040 }
 0xe32   :  { %1305 = vsyncpa [#allocation3], 1 }

</bundles_post_ra>
